<compile_context>
chip_gen: v5e
topology: v5e:2x2
jax: 0.10.0
libtpu: 0.0.40
codegen_flags: <defaults>
</compile_context>

<pallas_src>
import functools

import jax
import jax.numpy as jnp
from jax.experimental import pallas as pl
from jax.experimental.pallas import tpu as pltpu


def _round_up(x, m):
    return ((x + m - 1) // m) * m


def _pad2(x, rows, cols):
    r, c = x.shape
    if r == rows and c == cols:
        return x
    return jnp.pad(x, ((0, rows - r), (0, cols - c)))


def _tile_prefs():
    """(tm, tk) preferences per TPU generation (tn is always the padded out-width)."""
    try:
        kind = jax.devices()[0].device_kind.lower()
    except Exception:
        kind = ""
    if "v7" in kind or "v6" in kind:
        # ~3 MiB double-buffered at bf16 — comfortably inside v7x's 64 MiB.
        return 512, 1024
    # v2–v5 (incl. v5e/v5p) and unknown hardware: 512-wide blocks ≈85% of HBM
    # roofline and fit every generation's scoped VMEM.
    return 512, 512


def _choose_layout(n, tm_pref, tk_pref):
    """Pad node count so tm | n_pad and tk | n_pad; shrink tiles for tiny graphs."""
    q = max(tm_pref, tk_pref)          # power of two, multiple of both prefs
    if n >= q:
        return _round_up(n, q), tm_pref, tk_pref
    n_pad = _round_up(n, 128)          # small graph: lane-dense K, single k-tile
    tk = n_pad
    tm = min(tm_pref, n_pad)
    while n_pad % tm:                  # tm_pref is a power of two; terminates at <=128
        tm //= 2
    return n_pad, tm, tk


def _fused_gnn_layer_kernel(edges_ref, x_ref, w_ref, bias_ref, o_ref, acc_ref,
                            *, apply_act, neg_slope):
    """One (tm, tn) output tile of  edges @ (x @ W) + bias  (optional LeakyReLU)."""

    @pl.when(pl.program_id(2) == 0)
    def _():
        acc_ref[...] = jnp.zeros_like(acc_ref)

    # Tiny projection at the true feature width, recomputed per (i, k) tile —
    # cheaper than a separate pallas_call plus an HBM round-trip of the result.
    p = jnp.dot(x_ref[...], w_ref[...], preferred_element_type=jnp.float32)
    # Aggregation over the node (reduction) axis; f32 accumulation on the MXU.
    acc_ref[...] += jnp.dot(
        edges_ref[...], p.astype(jnp.bfloat16), preferred_element_type=jnp.float32
    )

    @pl.when(pl.program_id(2) == pl.num_programs(2) - 1)
    def _():
        r = acc_ref[...] + bias_ref[...]          # f32 epilogue (no bf16 VALU on v5e)
        if apply_act:
            r = jnp.maximum(r, neg_slope * r)     # LeakyReLU as a single VPU max
        o_ref[...] = r.astype(o_ref.dtype)


def _fused_block(edges_b, x_b, w_b, bias_p, *, apply_act, out_dtype, tm, tk,
                 neg_slope=0.01):
    """Padded-layout fused layer: returns edges_b @ (x_b @ w_b) + bias (act opt.)."""
    mp, kp = edges_b.shape
    kx, din = x_b.shape
    dw, nout = w_b.shape
    assert kx == kp and dw == din, (edges_b.shape, x_b.shape, w_b.shape)
    tn = nout  # padded output width (multiple of 128): one lane-dense column tile

    grid = (mp // tm, nout // tn, kp // tk)
    return pl.pallas_call(
        functools.partial(_fused_gnn_layer_kernel,
                          apply_act=apply_act, neg_slope=neg_slope),
        out_shape=jax.ShapeDtypeStruct((mp, nout), out_dtype),
        grid_spec=pltpu.PrefetchScalarGridSpec(
            num_scalar_prefetch=0,
            grid=grid,
            in_specs=[
                pl.BlockSpec((tm, tk), lambda i, j, k: (i, k)),    # edges (HBM-bound)
                pl.BlockSpec((tk, din), lambda i, j, k: (k, 0)),   # features / h tile
                pl.BlockSpec((din, tn), lambda i, j, k: (0, j)),   # W (VMEM resident)
                pl.BlockSpec((1, tn), lambda i, j, k: (0, j)),     # bias row
            ],
            out_specs=pl.BlockSpec((tm, tn), lambda i, j, k: (i, j)),
            scratch_shapes=[pltpu.VMEM((tm, tn), jnp.float32)],
        ),
        compiler_params=pltpu.CompilerParams(
            dimension_semantics=("parallel", "parallel", "arbitrary"),
            vmem_limit_bytes=32 * 1024 * 1024,
        ),
    )(edges_b, x_b, w_b, bias_p)


def gnn_forward(features, edges, w1, b1, w2, b2):
    n, din = features.shape
    hid = w1.shape[1]
    out_num = w2.shape[1]

    tm_pref, tk_pref = _tile_prefs()
    n_pad, tm, tk = _choose_layout(n, tm_pref, tk_pref)

    dinp = _round_up(din, 8)         # keep the true (small) projection K; sublane-align only
    hidp = _round_up(hid, 128)
    outp = _round_up(out_num, 128)

    # One-time pads / bf16 casts, hoisted out of the per-layer calls.  `edges`
    # is converted exactly once and reused by both aggregation layers.
    edges_b = _pad2(edges, n_pad, n_pad).astype(jnp.bfloat16)
    feats_b = _pad2(features, n_pad, dinp).astype(jnp.bfloat16)
    w1_b = _pad2(w1, dinp, hidp).astype(jnp.bfloat16)
    w2_b = _pad2(w2, hidp, outp).astype(jnp.bfloat16)
    b1_p = _pad2(b1.reshape(1, hid).astype(jnp.float32), 1, hidp)
    b2_p = _pad2(b2.reshape(1, out_num).astype(jnp.float32), 1, outp)

    # Layer 1: LeakyReLU(edges @ (features @ W1) + b1), kept as a padded bf16
    # slab so layer 2 consumes it with zero re-pad/re-cast glue.  Padded rows
    # of h carry LeakyReLU(b1) garbage; edges' zero-padded columns annihilate
    # them in the next aggregation, and the final slice drops padded columns.
    h = _fused_block(edges_b, feats_b, w1_b, b1_p,
                     apply_act=True, out_dtype=jnp.bfloat16, tm=tm, tk=tk)
    # Layer 2: edges @ (h @ W2) + b2, f32 output; slice removes all padding.
    out = _fused_block(edges_b, h, w2_b, b2_p,
                       apply_act=False, out_dtype=jnp.float32, tm=tm, tk=tk)
    return out[:n, :out_num]


def kaiming_uniform_relu(key, shape):
    # Block.__init__ calls torch.nn.init.kaiming_uniform_ directly on the raw
    # [in, hidden] tensor; fan_in = tensor.size(1), gain = sqrt(2),
    # bound = sqrt(6 / fan_in).
    fan_in = shape[1]
    bound = (6.0 / fan_in) ** 0.5
    return jax.random.uniform(key, shape, jnp.float32, minval=-bound, maxval=bound)


if __name__ == "__main__":
    N, IN_NUM, HIDDEN_NUM, OUT_NUM = 8, 16, 32, 8

    key = jax.random.PRNGKey(0)
    k_feat, k_edge, k_w1, k_w2, k_b1, k_b2 = jax.random.split(key, 6)

    features = jax.random.normal(k_feat, (N, IN_NUM), jnp.float32)
    # Dense row-normalized adjacency ("edges" propagation matrix).
    edges = jax.random.uniform(k_edge, (N, N), jnp.float32)
    edges = edges / jnp.sum(edges, axis=1, keepdims=True)

    w1 = kaiming_uniform_relu(k_w1, (IN_NUM, HIDDEN_NUM))
    w2 = kaiming_uniform_relu(k_w2, (HIDDEN_NUM, OUT_NUM))
    # The module inits biases to 0; small nonzero biases here exercise the
    # fused bias path (forward semantics are identical).
    b1 = 0.1 * jax.random.normal(k_b1, (HIDDEN_NUM,), jnp.float32)
    b2 = 0.1 * jax.random.normal(k_b2, (OUT_NUM,), jnp.float32)

    fwd = jax.jit(gnn_forward)
    out = fwd(features, edges, w1, b1, w2, b2)
    jax.block_until_ready(out)

    # Pure f32 JAX reference (eval-mode dropout = identity).
    def ref(features, edges, w1, b1, w2, b2):
        h = edges @ (features @ w1) + b1
        h = jnp.where(h > 0, h, 0.01 * h)
        return edges @ (h @ w2) + b2

    expected = ref(features, edges, w1, b1, w2, b2)
    max_err = jnp.max(jnp.abs(out - expected))
    assert out.shape == (N, OUT_NUM), out.shape
    # bf16 MXU operands / bf16 chained intermediate (f32 accumulation) vs f32 ref.
    assert jnp.allclose(out, expected, atol=5e-2, rtol=5e-2), f"mismatch: {max_err}"

    print("KERNEL_OK")
</pallas_src>

<mosaic_0001>
module attributes {stable_mosaic.version = 11 : i64} {
  func.func @_fused_gnn_layer_kernel(%arg0: i32, %arg1: i32, %arg2: i32, %arg3: memref<128x128xbf16, #tpu.memory_space<vmem>>, %arg4: memref<128x16xbf16, #tpu.memory_space<vmem>>, %arg5: memref<16x128xbf16, #tpu.memory_space<vmem>>, %arg6: memref<1x128xf32, #tpu.memory_space<vmem>>, %arg7: memref<128x128xbf16, #tpu.memory_space<vmem>>, %arg8: memref<128x128xf32, #tpu.memory_space<vmem>>) attributes {dimension_semantics = [#tpu.dimension_semantics<parallel>, #tpu.dimension_semantics<parallel>, #tpu.dimension_semantics<arbitrary>], iteration_bounds = array<i64: 1, 1, 1>, scalar_prefetch = 0 : i64, scratch_operands = 1 : i64, tpu.core_type = #tpu.core_type<tc>, window_params = [{transform_indices = @transform_0, window_bounds = array<i64: 128, 128>}, {transform_indices = @transform_1, window_bounds = array<i64: 128, 16>}, {transform_indices = @transform_2, window_bounds = array<i64: 16, 128>}, {transform_indices = @transform_3, window_bounds = array<i64: 1, 128>}, {transform_indices = @transform_4, window_bounds = array<i64: 128, 128>}]} {
    %c0_i32 = arith.constant 0 : i32
    %0 = arith.cmpi eq, %arg2, %c0_i32 : i32
    %1 = arith.extui %0 : i1 to i32
    %c0_i32_0 = arith.constant 0 : i32
    %2 = arith.cmpi ne, %1, %c0_i32_0 : i32
    scf.if %2 {
      %cst_13 = arith.constant 0.000000e+00 : f32
      %15 = vector.broadcast %cst_13 : f32 to vector<128x128xf32>
      %c0_14 = arith.constant 0 : index
      %c0_15 = arith.constant 0 : index
      %16 = vector.load %arg8[%c0_14, %c0_15] : memref<128x128xf32, #tpu.memory_space<vmem>>, vector<128x128xf32>
      tpu.vector_store %arg8[%c0_14, %c0_15], %15 {strides = array<i32>} : memref<128x128xf32, #tpu.memory_space<vmem>>, vector<128x128xf32>,
    } else {
    }
    %c0 = arith.constant 0 : index
    %c0_1 = arith.constant 0 : index
    %3 = vector.load %arg4[%c0, %c0_1] : memref<128x16xbf16, #tpu.memory_space<vmem>>, vector<128x16xbf16>
    %c0_2 = arith.constant 0 : index
    %c0_3 = arith.constant 0 : index
    %4 = vector.load %arg5[%c0_2, %c0_3] : memref<16x128xbf16, #tpu.memory_space<vmem>>, vector<16x128xbf16>
    %cst = arith.constant dense<0.000000e+00> : vector<128x128xf32>
    %5 = tpu.matmul %3, %4, %cst {dimension_numbers = #tpu.dot_dimension_numbers<[1], [0], [0], [1], [0, 0, 1, 1], [], []>} : vector<128x16xbf16>, vector<16x128xbf16>, vector<128x128xf32> -> vector<128x128xf32>
    %c0_4 = arith.constant 0 : index
    %c0_5 = arith.constant 0 : index
    %6 = vector.load %arg8[%c0_4, %c0_5] : memref<128x128xf32, #tpu.memory_space<vmem>>, vector<128x128xf32>
    %c0_6 = arith.constant 0 : index
    %c0_7 = arith.constant 0 : index
    %7 = vector.load %arg3[%c0_6, %c0_7] : memref<128x128xbf16, #tpu.memory_space<vmem>>, vector<128x128xbf16>
    %8 = arith.truncf %5 : vector<128x128xf32> to vector<128x128xbf16>
    %cst_8 = arith.constant dense<0.000000e+00> : vector<128x128xf32>
    %9 = tpu.matmul %7, %8, %cst_8 {dimension_numbers = #tpu.dot_dimension_numbers<[1], [0], [0], [1], [0, 0, 1, 1], [], []>} : vector<128x128xbf16>, vector<128x128xbf16>, vector<128x128xf32> -> vector<128x128xf32>
    %10 = arith.addf %6, %9 : vector<128x128xf32>
    %c0_9 = arith.constant 0 : index
    %c0_10 = arith.constant 0 : index
    %11 = vector.load %arg8[%c0_9, %c0_10] : memref<128x128xf32, #tpu.memory_space<vmem>>, vector<128x128xf32>
    tpu.vector_store %arg8[%c0_9, %c0_10], %10 {strides = array<i32>} : memref<128x128xf32, #tpu.memory_space<vmem>>, vector<128x128xf32>,
    %c0_i32_11 = arith.constant 0 : i32
    %12 = arith.cmpi eq, %arg2, %c0_i32_11 : i32
    %13 = arith.extui %12 : i1 to i32
    %c0_i32_12 = arith.constant 0 : i32
    %14 = arith.cmpi ne, %13, %c0_i32_12 : i32
    scf.if %14 {
      %c0_13 = arith.constant 0 : index
      %c0_14 = arith.constant 0 : index
      %15 = vector.load %arg8[%c0_13, %c0_14] : memref<128x128xf32, #tpu.memory_space<vmem>>, vector<128x128xf32>
      %c0_15 = arith.constant 0 : index
      %c0_16 = arith.constant 0 : index
      %16 = vector.load %arg6[%c0_15, %c0_16] : memref<1x128xf32, #tpu.memory_space<vmem>>, vector<1x128xf32>
      %17 = vector.broadcast %16 : vector<1x128xf32> to vector<128x128xf32>
      %18 = arith.addf %15, %17 : vector<128x128xf32>
      %cst_17 = arith.constant 0.00999999977 : f32
      %19 = vector.broadcast %cst_17 : f32 to vector<128x128xf32>
      %20 = arith.mulf %19, %18 : vector<128x128xf32>
      %21 = arith.maximumf %18, %20 : vector<128x128xf32>
      %22 = arith.truncf %21 : vector<128x128xf32> to vector<128x128xbf16>
      %c0_18 = arith.constant 0 : index
      %c0_19 = arith.constant 0 : index
      %23 = vector.load %arg7[%c0_18, %c0_19] : memref<128x128xbf16, #tpu.memory_space<vmem>>, vector<128x128xbf16>
      tpu.vector_store %arg7[%c0_18, %c0_19], %22 {strides = array<i32>} : memref<128x128xbf16, #tpu.memory_space<vmem>>, vector<128x128xbf16>,
    } else {
    }
    return
  }
  func.func @transform_0(%arg0: i32, %arg1: i32, %arg2: i32) -> (i32, i32) {
    %c0_i32 = arith.constant 0 : i32
    return %arg0, %arg2 : i32, i32
  }
  func.func @transform_1(%arg0: i32, %arg1: i32, %arg2: i32) -> (i32, i32) {
    %c0_i32 = arith.constant 0 : i32
    %c0_i32_0 = arith.constant 0 : i32
    return %arg2, %c0_i32 : i32, i32
  }
  func.func @transform_2(%arg0: i32, %arg1: i32, %arg2: i32) -> (i32, i32) {
    %c0_i32 = arith.constant 0 : i32
    %c0_i32_0 = arith.constant 0 : i32
    return %c0_i32, %arg1 : i32, i32
  }
  func.func @transform_3(%arg0: i32, %arg1: i32, %arg2: i32) -> (i32, i32) {
    %c0_i32 = arith.constant 0 : i32
    %c0_i32_0 = arith.constant 0 : i32
    return %c0_i32, %arg1 : i32, i32
  }
  func.func @transform_4(%arg0: i32, %arg1: i32, %arg2: i32) -> (i32, i32) {
    %c0_i32 = arith.constant 0 : i32
    return %arg0, %arg1 : i32, i32
  }
}

module attributes {stable_mosaic.version = 11 : i64} {
  func.func @_fused_gnn_layer_kernel(%arg0: i32, %arg1: i32, %arg2: i32, %arg3: memref<128x128xbf16, #tpu.memory_space<vmem>>, %arg4: memref<128x128xbf16, #tpu.memory_space<vmem>>, %arg5: memref<128x128xbf16, #tpu.memory_space<vmem>>, %arg6: memref<1x128xf32, #tpu.memory_space<vmem>>, %arg7: memref<128x128xf32, #tpu.memory_space<vmem>>, %arg8: memref<128x128xf32, #tpu.memory_space<vmem>>) attributes {dimension_semantics = [#tpu.dimension_semantics<parallel>, #tpu.dimension_semantics<parallel>, #tpu.dimension_semantics<arbitrary>], iteration_bounds = array<i64: 1, 1, 1>, scalar_prefetch = 0 : i64, scratch_operands = 1 : i64, tpu.core_type = #tpu.core_type<tc>, window_params = [{transform_indices = @transform_0, window_bounds = array<i64: 128, 128>}, {transform_indices = @transform_1, window_bounds = array<i64: 128, 128>}, {transform_indices = @transform_2, window_bounds = array<i64: 128, 128>}, {transform_indices = @transform_3, window_bounds = array<i64: 1, 128>}, {transform_indices = @transform_4, window_bounds = array<i64: 128, 128>}]} {
    %c0_i32 = arith.constant 0 : i32
    %0 = arith.cmpi eq, %arg2, %c0_i32 : i32
    %1 = arith.extui %0 : i1 to i32
    %c0_i32_0 = arith.constant 0 : i32
    %2 = arith.cmpi ne, %1, %c0_i32_0 : i32
    scf.if %2 {
      %cst_13 = arith.constant 0.000000e+00 : f32
      %15 = vector.broadcast %cst_13 : f32 to vector<128x128xf32>
      %c0_14 = arith.constant 0 : index
      %c0_15 = arith.constant 0 : index
      %16 = vector.load %arg8[%c0_14, %c0_15] : memref<128x128xf32, #tpu.memory_space<vmem>>, vector<128x128xf32>
      tpu.vector_store %arg8[%c0_14, %c0_15], %15 {strides = array<i32>} : memref<128x128xf32, #tpu.memory_space<vmem>>, vector<128x128xf32>,
    } else {
    }
    %c0 = arith.constant 0 : index
    %c0_1 = arith.constant 0 : index
    %3 = vector.load %arg4[%c0, %c0_1] : memref<128x128xbf16, #tpu.memory_space<vmem>>, vector<128x128xbf16>
    %c0_2 = arith.constant 0 : index
    %c0_3 = arith.constant 0 : index
    %4 = vector.load %arg5[%c0_2, %c0_3] : memref<128x128xbf16, #tpu.memory_space<vmem>>, vector<128x128xbf16>
    %cst = arith.constant dense<0.000000e+00> : vector<128x128xf32>
    %5 = tpu.matmul %3, %4, %cst {dimension_numbers = #tpu.dot_dimension_numbers<[1], [0], [0], [1], [0, 0, 1, 1], [], []>} : vector<128x128xbf16>, vector<128x128xbf16>, vector<128x128xf32> -> vector<128x128xf32>
    %c0_4 = arith.constant 0 : index
    %c0_5 = arith.constant 0 : index
    %6 = vector.load %arg8[%c0_4, %c0_5] : memref<128x128xf32, #tpu.memory_space<vmem>>, vector<128x128xf32>
    %c0_6 = arith.constant 0 : index
    %c0_7 = arith.constant 0 : index
    %7 = vector.load %arg3[%c0_6, %c0_7] : memref<128x128xbf16, #tpu.memory_space<vmem>>, vector<128x128xbf16>
    %8 = arith.truncf %5 : vector<128x128xf32> to vector<128x128xbf16>
    %cst_8 = arith.constant dense<0.000000e+00> : vector<128x128xf32>
    %9 = tpu.matmul %7, %8, %cst_8 {dimension_numbers = #tpu.dot_dimension_numbers<[1], [0], [0], [1], [0, 0, 1, 1], [], []>} : vector<128x128xbf16>, vector<128x128xbf16>, vector<128x128xf32> -> vector<128x128xf32>
    %10 = arith.addf %6, %9 : vector<128x128xf32>
    %c0_9 = arith.constant 0 : index
    %c0_10 = arith.constant 0 : index
    %11 = vector.load %arg8[%c0_9, %c0_10] : memref<128x128xf32, #tpu.memory_space<vmem>>, vector<128x128xf32>
    tpu.vector_store %arg8[%c0_9, %c0_10], %10 {strides = array<i32>} : memref<128x128xf32, #tpu.memory_space<vmem>>, vector<128x128xf32>,
    %c0_i32_11 = arith.constant 0 : i32
    %12 = arith.cmpi eq, %arg2, %c0_i32_11 : i32
    %13 = arith.extui %12 : i1 to i32
    %c0_i32_12 = arith.constant 0 : i32
    %14 = arith.cmpi ne, %13, %c0_i32_12 : i32
    scf.if %14 {
      %c0_13 = arith.constant 0 : index
      %c0_14 = arith.constant 0 : index
      %15 = vector.load %arg8[%c0_13, %c0_14] : memref<128x128xf32, #tpu.memory_space<vmem>>, vector<128x128xf32>
      %c0_15 = arith.constant 0 : index
      %c0_16 = arith.constant 0 : index
      %16 = vector.load %arg6[%c0_15, %c0_16] : memref<1x128xf32, #tpu.memory_space<vmem>>, vector<1x128xf32>
      %17 = vector.broadcast %16 : vector<1x128xf32> to vector<128x128xf32>
      %18 = arith.addf %15, %17 : vector<128x128xf32>
      %c0_17 = arith.constant 0 : index
      %c0_18 = arith.constant 0 : index
      %19 = vector.load %arg7[%c0_17, %c0_18] : memref<128x128xf32, #tpu.memory_space<vmem>>, vector<128x128xf32>
      tpu.vector_store %arg7[%c0_17, %c0_18], %18 {strides = array<i32>} : memref<128x128xf32, #tpu.memory_space<vmem>>, vector<128x128xf32>,
    } else {
    }
    return
  }
  func.func @transform_0(%arg0: i32, %arg1: i32, %arg2: i32) -> (i32, i32) {
    %c0_i32 = arith.constant 0 : i32
    return %arg0, %arg2 : i32, i32
  }
  func.func @transform_1(%arg0: i32, %arg1: i32, %arg2: i32) -> (i32, i32) {
    %c0_i32 = arith.constant 0 : i32
    %c0_i32_0 = arith.constant 0 : i32
    return %arg2, %c0_i32 : i32, i32
  }
  func.func @transform_2(%arg0: i32, %arg1: i32, %arg2: i32) -> (i32, i32) {
    %c0_i32 = arith.constant 0 : i32
    %c0_i32_0 = arith.constant 0 : i32
    return %c0_i32, %arg1 : i32, i32
  }
  func.func @transform_3(%arg0: i32, %arg1: i32, %arg2: i32) -> (i32, i32) {
    %c0_i32 = arith.constant 0 : i32
    %c0_i32_0 = arith.constant 0 : i32
    return %c0_i32, %arg1 : i32, i32
  }
  func.func @transform_4(%arg0: i32, %arg1: i32, %arg2: i32) -> (i32, i32) {
    %c0_i32 = arith.constant 0 : i32
    return %arg0, %arg1 : i32, i32
  }
}

</mosaic_0001>

<bundles_post_ra>
// kernel: gnn_forward.2
= control target key start
LH: loop header
LB: loop body
LE: loop exit
PB: predicated region body
PF: predicated region fallthrough
CT: control target
= control target key end

     0   :  { %vm102_vm0 = vcmask 130048   ;;  %s723_s2 = inlined_call_operand.vmem [shape: bf16[16,128], index: 2, kind: input, shape index: {}]   ;;  %s724_s1 = inlined_call_operand.vmem [shape: bf16[128,16], index: 1, kind: input, shape index: {}]   ;;  %s725_s3 = inlined_call_operand.vmem [shape: f32[1,128], index: 3, kind: input, shape index: {}]   ;;  %s726_s0 = inlined_call_operand.vmem [shape: bf16[128,128], index: 0, kind: input, shape index: {}]   ;;  %s727_s4 = inlined_call_operand.vmem [shape: bf16[128,128], index: 4, kind: output, shape index: {}]  }
   0x1   :  { %v536_v0 = vld [vmem:[%s723_s2] sm:$0xff]  ;;  %v533_v2 = vld [vmem:[%s724_s1 + $0x28] sm:$0xff]  ;;  %v534_v4 = vld [vmem:[%s724_s1 + $0x30] sm:$0xff] }
   0x2   :  { %v528_v1 = vld [vmem:[%s724_s1] sm:$0xff]  ;;  %134 = vmatpush.bf16.msra.mxu0 %v536_v0  ;;  %592 = vmatpush.bf16.msra.mxu3 %v536_v0  ;;  %v529_v3 = vld [vmem:[%s724_s1 + $0x8] sm:$0xff]  ;;  %v530_v5 = vld [vmem:[%s724_s1 + $0x10] sm:$0xff] }
   0x3   :  { %v535_v6 = vld [vmem:[%s724_s1 + $0x38] sm:$0xff]  ;;  %v532_v8 = vld [vmem:[%s724_s1 + $0x20] sm:$0xff]  ;;  %v538_v35 = vld [vmem:[%s726_s0 + $0x8] sm:$0xff] }
   0x4   :  { %v531_v7 = vld [vmem:[%s724_s1 + $0x18] sm:$0xff]  ;;  %v537_v33 = vld [vmem:[%s726_s0] sm:$0xff]  ;;  %v542_v36 = vld [vmem:[%s726_s0 + $0x28] sm:$0xff] }
   0x5   :  { %488 = vmatmul.msk.bf16.vlgmr.msra.gmra.mxu0 %vm102_vm0, %v528_v1  ;;  %493 = vmatmul.msk.bf16.vlgmr.msra.gmra.mxu3 %vm102_vm0, %v533_v2  ;;  %v541_v34 = vld [vmem:[%s726_s0 + $0x20] sm:$0xff]  ;;  %v539_v37 = vld [vmem:[%s726_s0 + $0x10] sm:$0xff]  ;;  %v540_v39 = vld [vmem:[%s726_s0 + $0x18] sm:$0xff] }
   0x6   :  { %v543_v38 = vld [vmem:[%s726_s0 + $0x30] sm:$0xff]  ;;  %v544_v40 = vld [vmem:[%s726_s0 + $0x38] sm:$0xff]  ;;  %v681_v42 = vld [vmem:[%s725_s3] ss:$0 sm:$0xff] }
  0x15   :  { %489 = vmatmul.msk.bf16.gmra.mxu0 %vm102_vm0, %v529_v3  ;;  %494 = vmatmul.msk.bf16.gmra.mxu3 %vm102_vm0, %v534_v4 }
  0x25   :  { %490 = vmatmul.msk.bf16.gmra.mxu0 %vm102_vm0, %v530_v5  ;;  %495 = vmatmul.msk.bf16.gmra.mxu3 %vm102_vm0, %v535_v6 }
  0x35   :  { %491 = vmatmul.msk.bf16.gmra.mxu0 %vm102_vm0, %v531_v7 }
  0x45   :  { %492 = vmatmul.msk.bf16.gmra.mxu0 %vm102_vm0, %v532_v8 }
  0x82   :  { %v136_v9 = vpop.f32.mrf.mxu0 }
  0x88   :  { %v161_v10 = vpop.f32.mrf.mxu3 }
  0x8a   :  { %v138_v11 = vpop.f32.mrf.mxu0 }
  0x8b   :  { %v208_v12 = vpack.c.bf16 %v138_v11, %v136_v9 }
  0x90   :  { %v163_v13 = vpop.f32.mrf.mxu3 }
  0x91   :  { %v213_v25 = vpack.c.bf16 %v163_v13, %v161_v10 }
  0x92   :  { %v141_v14 = vpop.f32.mrf.mxu0 }
  0x98   :  { %v166_v15 = vpop.f32.mrf.mxu3 }
  0x9a   :  { %v143_v16 = vpop.f32.mrf.mxu0 }
  0x9b   :  { %v209_v32 = vpack.c.bf16 %v143_v16, %v141_v14 }
  0xa0   :  { %v168_v17 = vpop.f32.mrf.mxu3 }
  0xa1   :  { %v214_v24 = vpack.c.bf16 %v168_v17, %v166_v15 }
  0xa2   :  { %v146_v18 = vpop.f32.mrf.mxu0 }
  0xa8   :  { %v171_v19 = vpop.f32.mrf.mxu3 }
  0xaa   :  { %v148_v20 = vpop.f32.mrf.mxu0 }
  0xab   :  { %v210_v31 = vpack.c.bf16 %v148_v20, %v146_v18 }
  0xb0   :  { %v173_v21 = vpop.f32.mrf.mxu3 }
  0xb1   :  { %v215_v22 = vpack.c.bf16 %v173_v21, %v171_v19 }
  0xb2   :  { %v151_v23 = vpop.f32.mrf.mxu0 }
  0xb3   :  { %264 = vmatpush.bf16.msra.mxu1 %v215_v22  ;;  %593 = vmatpush.bf16.msra.mxu2 %v215_v22 }
  0xb7   :  { %265 = vmatpush.bf16.msra.mxu1 %v214_v24  ;;  %594 = vmatpush.bf16.msra.mxu2 %v214_v24 }
  0xba   :  { %v153_v26 = vpop.f32.mrf.mxu0 }
  0xbb   :  { %266 = vmatpush.bf16.msra.mxu1 %v213_v25  ;;  %595 = vmatpush.bf16.msra.mxu2 %v213_v25  ;;  %v211_v30 = vpack.c.bf16 %v153_v26, %v151_v23 }
  0xc2   :  { %v156_v27 = vpop.f32.mrf.mxu0 }
  0xca   :  { %v158_v28 = vpop.f32.mrf.mxu0 }
  0xcb   :  { %v212_v29 = vpack.c.bf16 %v158_v28, %v156_v27 }
  0xcd   :  { %267 = vmatpush.bf16.msra.mxu1 %v212_v29  ;;  %596 = vmatpush.bf16.msra.mxu2 %v212_v29 }
  0xd1   :  { %268 = vmatpush.bf16.msra.mxu1 %v211_v30  ;;  %597 = vmatpush.bf16.msra.mxu2 %v211_v30 }
  0xd5   :  { %269 = vmatpush.bf16.msra.mxu1 %v210_v31  ;;  %598 = vmatpush.bf16.msra.mxu2 %v210_v31 }
  0xd9   :  { %270 = vmatpush.bf16.msra.mxu1 %v209_v32  ;;  %599 = vmatpush.bf16.msra.mxu2 %v209_v32 }
  0xdd   :  { %271 = vmatpush.bf16.msra.mxu1 %v208_v12  ;;  %600 = vmatpush.bf16.msra.mxu2 %v208_v12 }
  0xe0   :  { %272 = vmatmul.bf16.vlgmr.msra.gmra.mxu1 %v537_v33  ;;  %292 = vmatmul.bf16.vlgmr.msra.gmra.mxu2 %v541_v34 }
  0xf0   :  { %277 = vmatmul.bf16.gmra.mxu1 %v538_v35  ;;  %297 = vmatmul.bf16.gmra.mxu2 %v542_v36 }
 0x100   :  { %282 = vmatmul.bf16.gmra.mxu1 %v539_v37  ;;  %302 = vmatmul.bf16.gmra.mxu2 %v543_v38 }
 0x110   :  { %287 = vmatmul.bf16.gmra.mxu1 %v540_v39  ;;  %307 = vmatmul.bf16.gmra.mxu2 %v544_v40 }
 0x15d   :  { %v273_v41 = vpop.f32.mrf.mxu1 }
 0x15e   :  { %v368_v43 = vadd.f32 %v681_v42, %v273_v41 }
 0x160   :  { %v384_v46 = vmul.f32 0.01, %v368_v43 }
 0x162   :  { %v400_v50 = vmax.f32 %v368_v43, %v384_v46 }
 0x163   :  { %v293_v44 = vpop.f32.mrf.mxu2 }
 0x164   :  { %v376_v48 = vadd.f32 %v681_v42, %v293_v44 }
 0x165   :  { %v275_v45 = vpop.f32.mrf.mxu1 }
 0x166   :  { %v369_v47 = vadd.f32 %v681_v42, %v275_v45  ;;  %v392_v53 = vmul.f32 0.01, %v376_v48 }
 0x168   :  { %v385_v49 = vmul.f32 0.01, %v369_v47  ;;  %v408_v58 = vmax.f32 %v376_v48, %v392_v53 }
 0x16a   :  { %v401_v51 = vmax.f32 %v369_v47, %v385_v49 }
 0x16b   :  { %v295_v52 = vpop.f32.mrf.mxu2 }
 0x16c   :  { %v548_v54 = vpack.c.bf16 %v401_v51, %v400_v50  ;;  %v377_v55 = vadd.f32 %v681_v42, %v295_v52 }
 0x16d   :  { %v278_v56 = vpop.f32.mrf.mxu1 }
 0x16e   :  { %549 = vst [vmem:[%s727_s4] sm:$0xff] %v548_v54   ;;  %v393_v57 = vmul.f32 0.01, %v377_v55  ;;  %v370_v61 = vadd.f32 %v681_v42, %v278_v56 }
 0x170   :  { %v409_v59 = vmax.f32 %v377_v55, %v393_v57  ;;  %v386_v0 = vmul.f32 0.01, %v370_v61 }
 0x172   :  { %v568_v60 = vpack.c.bf16 %v409_v59, %v408_v58  ;;  %v402_v4 = vmax.f32 %v370_v61, %v386_v0 }
 0x173   :  { %v298_v62 = vpop.f32.mrf.mxu2 }
 0x174   :  { %588 = vst [vmem:[%s727_s4 + $0x20] sm:$0xff] %v568_v60   ;;  %v378_v2 = vadd.f32 %v681_v42, %v298_v62 }
 0x175   :  { %v280_v63 = vpop.f32.mrf.mxu1 }
 0x176   :  { %v371_v1 = vadd.f32 %v681_v42, %v280_v63  ;;  %v394_v7 = vmul.f32 0.01, %v378_v2 }
 0x178   :  { %v387_v3 = vmul.f32 0.01, %v371_v1  ;;  %v410_v12 = vmax.f32 %v378_v2, %v394_v7 }
 0x17a   :  { %v403_v5 = vmax.f32 %v371_v1, %v387_v3 }
 0x17b   :  { %v300_v6 = vpop.f32.mrf.mxu2 }
 0x17c   :  { %v553_v8 = vpack.c.bf16 %v403_v5, %v402_v4  ;;  %v379_v9 = vadd.f32 %v681_v42, %v300_v6 }
 0x17d   :  { %v283_v10 = vpop.f32.mrf.mxu1 }
 0x17e   :  { %585 = vst [vmem:[%s727_s4 + $0x8] sm:$0xff] %v553_v8   ;;  %v395_v11 = vmul.f32 0.01, %v379_v9  ;;  %v372_v15 = vadd.f32 %v681_v42, %v283_v10 }
 0x180   :  { %v411_v13 = vmax.f32 %v379_v9, %v395_v11  ;;  %v388_v18 = vmul.f32 0.01, %v372_v15 }
 0x182   :  { %v573_v14 = vpack.c.bf16 %v411_v13, %v410_v12  ;;  %v404_v22 = vmax.f32 %v372_v15, %v388_v18 }
 0x183   :  { %v303_v16 = vpop.f32.mrf.mxu2 }
 0x184   :  { %589 = vst [vmem:[%s727_s4 + $0x28] sm:$0xff] %v573_v14   ;;  %v380_v20 = vadd.f32 %v681_v42, %v303_v16 }
 0x185   :  { %v285_v17 = vpop.f32.mrf.mxu1 }
 0x186   :  { %v373_v19 = vadd.f32 %v681_v42, %v285_v17  ;;  %v396_v25 = vmul.f32 0.01, %v380_v20 }
 0x188   :  { %v389_v21 = vmul.f32 0.01, %v373_v19  ;;  %v412_v30 = vmax.f32 %v380_v20, %v396_v25 }
 0x18a   :  { %v405_v23 = vmax.f32 %v373_v19, %v389_v21 }
 0x18b   :  { %v305_v24 = vpop.f32.mrf.mxu2 }
 0x18c   :  { %v558_v26 = vpack.c.bf16 %v405_v23, %v404_v22  ;;  %v381_v27 = vadd.f32 %v681_v42, %v305_v24 }
 0x18d   :  { %v288_v28 = vpop.f32.mrf.mxu1 }
 0x18e   :  { %586 = vst [vmem:[%s727_s4 + $0x10] sm:$0xff] %v558_v26   ;;  %v397_v29 = vmul.f32 0.01, %v381_v27  ;;  %v374_v33 = vadd.f32 %v681_v42, %v288_v28 }
 0x190   :  { %v413_v31 = vmax.f32 %v381_v27, %v397_v29  ;;  %v390_v36 = vmul.f32 0.01, %v374_v33 }
 0x192   :  { %v578_v32 = vpack.c.bf16 %v413_v31, %v412_v30  ;;  %v406_v40 = vmax.f32 %v374_v33, %v390_v36 }
 0x193   :  { %v308_v34 = vpop.f32.mrf.mxu2 }
 0x194   :  { %590 = vst [vmem:[%s727_s4 + $0x30] sm:$0xff] %v578_v32   ;;  %v382_v38 = vadd.f32 %v681_v42, %v308_v34 }
 0x195   :  { %v290_v35 = vpop.f32.mrf.mxu1 }
 0x196   :  { %v375_v37 = vadd.f32 %v681_v42, %v290_v35  ;;  %v398_v44 = vmul.f32 0.01, %v382_v38 }
 0x198   :  { %v391_v39 = vmul.f32 0.01, %v375_v37  ;;  %v414_v48 = vmax.f32 %v382_v38, %v398_v44 }
 0x19a   :  { %v407_v41 = vmax.f32 %v375_v37, %v391_v39 }
 0x19b   :  { %v310_v43 = vpop.f32.mrf.mxu2 }
 0x19c   :  { %v563_v45 = vpack.c.bf16 %v407_v41, %v406_v40  ;;  %v383_v46 = vadd.f32 %v681_v42, %v310_v43 }
 0x19e   :  { %587 = vst [vmem:[%s727_s4 + $0x18] sm:$0xff] %v563_v45   ;;  %v399_v47 = vmul.f32 0.01, %v383_v46 }
 0x1a0   :  { %v415_v49 = vmax.f32 %v383_v46, %v399_v47 }
 0x1a2   :  { %v583_v50 = vpack.c.bf16 %v415_v49, %v414_v48 }
 0x1a4   :  { %591 = vst [vmem:[%s727_s4 + $0x38] sm:$0xff] %v583_v50  }

// kernel: gnn_forward.3
= control target key start
LH: loop header
LB: loop body
LE: loop exit
PB: predicated region body
PF: predicated region fallthrough
CT: control target
= control target key end

     0   :  { %s727_s2 = inlined_call_operand.vmem [shape: bf16[128,128], index: 2, kind: input, shape index: {}]   ;;  %s728_s1 = inlined_call_operand.vmem [shape: bf16[128,128], index: 1, kind: input, shape index: {}]   ;;  %s729_s3 = inlined_call_operand.vmem [shape: f32[1,128], index: 3, kind: input, shape index: {}]   ;;  %s730_s0 = inlined_call_operand.vmem [shape: bf16[128,128], index: 0, kind: input, shape index: {}]   ;;  %s731_s4 = inlined_call_operand.vmem [shape: f32[128,128], index: 4, kind: output, shape index: {}]  }
   0x1   :  { %v553_v0 = vld [vmem:[%s727_s2 + $0x38] sm:$0xff]  ;;  %v552_v1 = vld [vmem:[%s727_s2 + $0x30] sm:$0xff]  ;;  %v551_v2 = vld [vmem:[%s727_s2 + $0x28] sm:$0xff] }
   0x2   :  { %562 = vmatpush.bf16.msra.mxu2 %v553_v0  ;;  %165 = vmatpush.bf16.msra.mxu0 %v553_v0  ;;  %v550_v3 = vld [vmem:[%s727_s2 + $0x20] sm:$0xff]  ;;  %v549_v4 = vld [vmem:[%s727_s2 + $0x18] sm:$0xff]  ;;  %v548_v5 = vld [vmem:[%s727_s2 + $0x10] sm:$0xff] }
   0x3   :  { %v547_v6 = vld [vmem:[%s727_s2 + $0x8] sm:$0xff]  ;;  %v546_v7 = vld [vmem:[%s727_s2] sm:$0xff]  ;;  %v544_v12 = vld [vmem:[%s728_s1 + $0x30] sm:$0xff] }
   0x4   :  { %v542_v8 = vld [vmem:[%s728_s1 + $0x20] sm:$0xff]  ;;  %v543_v10 = vld [vmem:[%s728_s1 + $0x28] sm:$0xff]  ;;  %v540_v13 = vld [vmem:[%s728_s1 + $0x10] sm:$0xff] }
   0x5   :  { %v538_v9 = vld [vmem:[%s728_s1] sm:$0xff]  ;;  %v539_v11 = vld [vmem:[%s728_s1 + $0x8] sm:$0xff]  ;;  %v545_v14 = vld [vmem:[%s728_s1 + $0x38] sm:$0xff] }
   0x6   :  { %563 = vmatpush.bf16.msra.mxu2 %v552_v1  ;;  %166 = vmatpush.bf16.msra.mxu0 %v552_v1  ;;  %v541_v15 = vld [vmem:[%s728_s1 + $0x18] sm:$0xff]  ;;  %v554_v40 = vld [vmem:[%s730_s0] sm:$0xff]  ;;  %v555_v42 = vld [vmem:[%s730_s0 + $0x8] sm:$0xff] }
   0x7   :  { %v558_v41 = vld [vmem:[%s730_s0 + $0x20] sm:$0xff]  ;;  %v559_v43 = vld [vmem:[%s730_s0 + $0x28] sm:$0xff]  ;;  %v556_v44 = vld [vmem:[%s730_s0 + $0x10] sm:$0xff] }
   0x8   :  { %v560_v45 = vld [vmem:[%s730_s0 + $0x30] sm:$0xff]  ;;  %v557_v46 = vld [vmem:[%s730_s0 + $0x18] sm:$0xff]  ;;  %v578_v48 = vld [vmem:[%s729_s3] ss:$0 sm:$0xff] }
   0x9   :  { %v561_v47 = vld [vmem:[%s730_s0 + $0x38] sm:$0xff] }
   0xa   :  { %564 = vmatpush.bf16.msra.mxu2 %v551_v2  ;;  %167 = vmatpush.bf16.msra.mxu0 %v551_v2 }
   0xe   :  { %565 = vmatpush.bf16.msra.mxu2 %v550_v3  ;;  %168 = vmatpush.bf16.msra.mxu0 %v550_v3 }
  0x12   :  { %566 = vmatpush.bf16.msra.mxu2 %v549_v4  ;;  %169 = vmatpush.bf16.msra.mxu0 %v549_v4 }
  0x16   :  { %567 = vmatpush.bf16.msra.mxu2 %v548_v5  ;;  %170 = vmatpush.bf16.msra.mxu0 %v548_v5 }
  0x1a   :  { %568 = vmatpush.bf16.msra.mxu2 %v547_v6  ;;  %171 = vmatpush.bf16.msra.mxu0 %v547_v6 }
  0x1e   :  { %569 = vmatpush.bf16.msra.mxu2 %v546_v7  ;;  %172 = vmatpush.bf16.msra.mxu0 %v546_v7 }
  0x21   :  { %193 = vmatmul.bf16.vlgmr.msra.gmra.mxu2 %v542_v8  ;;  %173 = vmatmul.bf16.vlgmr.msra.gmra.mxu0 %v538_v9 }
  0x31   :  { %198 = vmatmul.bf16.gmra.mxu2 %v543_v10  ;;  %178 = vmatmul.bf16.gmra.mxu0 %v539_v11 }
  0x41   :  { %203 = vmatmul.bf16.gmra.mxu2 %v544_v12  ;;  %183 = vmatmul.bf16.gmra.mxu0 %v540_v13 }
  0x51   :  { %208 = vmatmul.bf16.gmra.mxu2 %v545_v14  ;;  %188 = vmatmul.bf16.gmra.mxu0 %v541_v15 }
  0x9e   :  { %v174_v17 = vpop.f32.mrf.mxu0 }
  0xa4   :  { %v194_v16 = vpop.f32.mrf.mxu2 }
  0xa6   :  { %v176_v19 = vpop.f32.mrf.mxu0 }
  0xa7   :  { %v246_v39 = vpack.c.bf16 %v176_v19, %v174_v17 }
  0xac   :  { %v196_v18 = vpop.f32.mrf.mxu2 }
  0xad   :  { %v250_v34 = vpack.c.bf16 %v196_v18, %v194_v16 }
  0xae   :  { %v179_v21 = vpop.f32.mrf.mxu0 }
  0xb4   :  { %v199_v20 = vpop.f32.mrf.mxu2 }
  0xb6   :  { %v181_v23 = vpop.f32.mrf.mxu0 }
  0xb7   :  { %v247_v38 = vpack.c.bf16 %v181_v23, %v179_v21 }
  0xbc   :  { %v201_v22 = vpop.f32.mrf.mxu2 }
  0xbd   :  { %v251_v33 = vpack.c.bf16 %v201_v22, %v199_v20 }
  0xbe   :  { %v184_v25 = vpop.f32.mrf.mxu0 }
  0xc4   :  { %v204_v24 = vpop.f32.mrf.mxu2 }
  0xc6   :  { %v186_v28 = vpop.f32.mrf.mxu0 }
  0xc7   :  { %v248_v37 = vpack.c.bf16 %v186_v28, %v184_v25 }
  0xcc   :  { %v206_v26 = vpop.f32.mrf.mxu2 }
  0xcd   :  { %v252_v32 = vpack.c.bf16 %v206_v26, %v204_v24 }
  0xce   :  { %v189_v31 = vpop.f32.mrf.mxu0 }
  0xd4   :  { %v209_v27 = vpop.f32.mrf.mxu2 }
  0xd6   :  { %v191_v35 = vpop.f32.mrf.mxu0 }
  0xd7   :  { %v249_v36 = vpack.c.bf16 %v191_v35, %v189_v31 }
  0xdc   :  { %v211_v29 = vpop.f32.mrf.mxu2 }
  0xdd   :  { %v253_v30 = vpack.c.bf16 %v211_v29, %v209_v27 }
  0xdf   :  { %302 = vmatpush.bf16.msra.mxu1 %v253_v30  ;;  %570 = vmatpush.bf16.msra.mxu3 %v253_v30 }
  0xe3   :  { %303 = vmatpush.bf16.msra.mxu1 %v252_v32  ;;  %571 = vmatpush.bf16.msra.mxu3 %v252_v32 }
  0xe7   :  { %304 = vmatpush.bf16.msra.mxu1 %v251_v33  ;;  %572 = vmatpush.bf16.msra.mxu3 %v251_v33 }
  0xeb   :  { %305 = vmatpush.bf16.msra.mxu1 %v250_v34  ;;  %573 = vmatpush.bf16.msra.mxu3 %v250_v34 }
  0xef   :  { %306 = vmatpush.bf16.msra.mxu1 %v249_v36  ;;  %574 = vmatpush.bf16.msra.mxu3 %v249_v36 }
  0xf3   :  { %307 = vmatpush.bf16.msra.mxu1 %v248_v37  ;;  %575 = vmatpush.bf16.msra.mxu3 %v248_v37 }
  0xf7   :  { %308 = vmatpush.bf16.msra.mxu1 %v247_v38  ;;  %576 = vmatpush.bf16.msra.mxu3 %v247_v38 }
  0xfb   :  { %309 = vmatpush.bf16.msra.mxu1 %v246_v39  ;;  %577 = vmatpush.bf16.msra.mxu3 %v246_v39 }
  0xfe   :  { %310 = vmatmul.bf16.vlgmr.msra.gmra.mxu1 %v554_v40  ;;  %330 = vmatmul.bf16.vlgmr.msra.gmra.mxu3 %v558_v41 }
 0x10e   :  { %315 = vmatmul.bf16.gmra.mxu1 %v555_v42  ;;  %335 = vmatmul.bf16.gmra.mxu3 %v559_v43 }
 0x11e   :  { %320 = vmatmul.bf16.gmra.mxu1 %v556_v44  ;;  %340 = vmatmul.bf16.gmra.mxu3 %v560_v45 }
 0x12e   :  { %325 = vmatmul.bf16.gmra.mxu1 %v557_v46  ;;  %345 = vmatmul.bf16.gmra.mxu3 %v561_v47 }
 0x17b   :  { %v311_v49 = vpop.f32.mrf.mxu1 }
 0x17c   :  { %v406_v50 = vadd.f32 %v578_v48, %v311_v49 }
 0x17e   :  { %422 = vst [vmem:[%s731_s4] sm:$0xff] %v406_v50 }
 0x181   :  { %v331_v51 = vpop.f32.mrf.mxu3 }
 0x182   :  { %v414_v52 = vadd.f32 %v578_v48, %v331_v51 }
 0x183   :  { %v313_v53 = vpop.f32.mrf.mxu1 }
 0x184   :  { %430 = vst [vmem:[%s731_s4 + $0x40] sm:$0xff] %v414_v52  ;;  %v407_v54 = vadd.f32 %v578_v48, %v313_v53 }
 0x186   :  { %423 = vst [vmem:[%s731_s4 + $0x8] sm:$0xff] %v407_v54 }
 0x189   :  { %v333_v55 = vpop.f32.mrf.mxu3 }
 0x18a   :  { %v415_v56 = vadd.f32 %v578_v48, %v333_v55 }
 0x18b   :  { %v316_v57 = vpop.f32.mrf.mxu1 }
 0x18c   :  { %431 = vst [vmem:[%s731_s4 + $0x48] sm:$0xff] %v415_v56  ;;  %v408_v58 = vadd.f32 %v578_v48, %v316_v57 }
 0x18e   :  { %424 = vst [vmem:[%s731_s4 + $0x10] sm:$0xff] %v408_v58 }
 0x191   :  { %v336_v59 = vpop.f32.mrf.mxu3 }
 0x192   :  { %v416_v60 = vadd.f32 %v578_v48, %v336_v59 }
 0x193   :  { %v318_v61 = vpop.f32.mrf.mxu1 }
 0x194   :  { %432 = vst [vmem:[%s731_s4 + $0x50] sm:$0xff] %v416_v60  ;;  %v409_v62 = vadd.f32 %v578_v48, %v318_v61 }
 0x196   :  { %425 = vst [vmem:[%s731_s4 + $0x18] sm:$0xff] %v409_v62 }
 0x199   :  { %v338_v63 = vpop.f32.mrf.mxu3 }
 0x19a   :  { %v417_v0 = vadd.f32 %v578_v48, %v338_v63 }
 0x19b   :  { %v321_v1 = vpop.f32.mrf.mxu1 }
 0x19c   :  { %433 = vst [vmem:[%s731_s4 + $0x58] sm:$0xff] %v417_v0  ;;  %v410_v2 = vadd.f32 %v578_v48, %v321_v1 }
 0x19e   :  { %426 = vst [vmem:[%s731_s4 + $0x20] sm:$0xff] %v410_v2 }
 0x1a1   :  { %v341_v3 = vpop.f32.mrf.mxu3 }
 0x1a2   :  { %v418_v4 = vadd.f32 %v578_v48, %v341_v3 }
 0x1a3   :  { %v323_v5 = vpop.f32.mrf.mxu1 }
 0x1a4   :  { %434 = vst [vmem:[%s731_s4 + $0x60] sm:$0xff] %v418_v4  ;;  %v411_v6 = vadd.f32 %v578_v48, %v323_v5 }
 0x1a6   :  { %427 = vst [vmem:[%s731_s4 + $0x28] sm:$0xff] %v411_v6 }
 0x1a9   :  { %v343_v7 = vpop.f32.mrf.mxu3 }
 0x1aa   :  { %v419_v8 = vadd.f32 %v578_v48, %v343_v7 }
 0x1ab   :  { %v326_v9 = vpop.f32.mrf.mxu1 }
 0x1ac   :  { %435 = vst [vmem:[%s731_s4 + $0x68] sm:$0xff] %v419_v8  ;;  %v412_v10 = vadd.f32 %v578_v48, %v326_v9 }
 0x1ae   :  { %428 = vst [vmem:[%s731_s4 + $0x30] sm:$0xff] %v412_v10 }
 0x1b1   :  { %v346_v11 = vpop.f32.mrf.mxu3 }
 0x1b2   :  { %v420_v12 = vadd.f32 %v578_v48, %v346_v11 }
 0x1b3   :  { %v328_v13 = vpop.f32.mrf.mxu1 }
 0x1b4   :  { %436 = vst [vmem:[%s731_s4 + $0x70] sm:$0xff] %v420_v12  ;;  %v413_v14 = vadd.f32 %v578_v48, %v328_v13 }
 0x1b6   :  { %429 = vst [vmem:[%s731_s4 + $0x38] sm:$0xff] %v413_v14 }
 0x1b9   :  { %v348_v15 = vpop.f32.mrf.mxu3 }
 0x1ba   :  { %v421_v16 = vadd.f32 %v578_v48, %v348_v15 }
 0x1bc   :  { %437 = vst [vmem:[%s731_s4 + $0x78] sm:$0xff] %v421_v16 }

</bundles_post_ra>
